<compile_context>
chip_gen: v7x
topology: tpu7x:2x2x1
jax: 0.10.0
libtpu: 0.0.40
codegen_flags: <defaults>
</compile_context>

<pallas_src>
import functools
import math

import jax
import jax.numpy as jnp
from jax.experimental import pallas as pl
from jax.experimental.pallas import tpu as pltpu

EPS = 1e-5
_LANE = 128
_SUB = 8  # f32 sublane tile


def _round_up(x, m):
    return (x + m - 1) // m * m


def _vmem_capacity_bytes():
    """Physical VMEM per core; conservative (v7x-sized) fallback."""
    try:
        info = pltpu.get_tpu_info()
        cap = getattr(info, "vmem_capacity_bytes", None)
        if cap:
            return int(cap)
    except Exception:
        pass
    return 64 << 20


def _dice_partial_kernel(pred_ref, gt_ref, out_ref, tp_acc, dn_acc, *,
                         rows_total, tile_r, needs_mask):
    # pred_ref / gt_ref: (1, tile_r, 128) VMEM tiles (native dtype).
    # out_ref: (1, 2, 128) f32, resident across the reduction axis; row 0 holds
    #          the per-sample lane-wise tp partial, row 1 the denom partial.
    # tp_acc / dn_acc: (tile_r, 128) f32 elementwise accumulators.
    r = pl.program_id(1)

    @pl.when(r == 0)
    def _init():
        tp_acc[...] = jnp.zeros_like(tp_acc)
        dn_acc[...] = jnp.zeros_like(dn_acc)

    pred = pred_ref[0].astype(jnp.float32)  # (tile_r, 128)
    gt = gt_ref[0].astype(jnp.float32)

    if needs_mask:
        # Only the last block of the row axis is partial; masking is cheap
        # VPU work and is a no-op for full blocks.
        rows_left = rows_total - r * tile_r
        row_ids = jax.lax.broadcasted_iota(jnp.int32, (tile_r, _LANE), 0)
        valid = row_ids < rows_left
        pred = jnp.where(valid, pred, 0.0)
        gt = jnp.where(valid, gt, 0.0)

    # Hot loop: pure VPU adds, no cross-lane/sublane reductions.
    tp_acc[...] += gt * pred
    dn_acc[...] += pred + gt

    @pl.when(r == pl.num_programs(1) - 1)
    def _finalize():
        # One cross-sublane reduce per sample; the cross-lane sum + dice +
        # batch mean are finished in the wrapper.
        out_ref[0, 0:1, :] = jnp.sum(tp_acc[...], axis=0, keepdims=True)
        out_ref[0, 1:2, :] = jnp.sum(dn_acc[...], axis=0, keepdims=True)


def binary_dice_loss(y_pr, y_gt):
    """BinaryDiceLoss()(y_pr, y_gt) with activation=None. Inputs are NCHW."""
    assert y_pr.shape == y_gt.shape
    n = y_pr.shape[0]
    flat = math.prod(y_pr.shape[1:])

    item_p = jnp.dtype(y_pr.dtype).itemsize
    item_g = jnp.dtype(y_gt.dtype).itemsize

    # Sublane-dense per-sample slabs (N, R, 128).  When F is 128-aligned this
    # is a metadata-only reshape (no HBM traffic).
    f_pad = _round_up(flat, _LANE)
    pred2d = y_pr.reshape(n, flat)
    gt2d = y_gt.reshape(n, flat)
    if f_pad != flat:
        # TODO(synk): for F not a multiple of 128 this still costs one extra
        # HBM pass (jnp.pad); a fully pad-free path would need manual DMA of
        # the ragged tail.  Zero padding is neutral for tp / (sum_pred+sum_gt).
        pred2d = jnp.pad(pred2d, ((0, 0), (0, f_pad - flat)))
        gt2d = jnp.pad(gt2d, ((0, 0), (0, f_pad - flat)))
    rows = f_pad // _LANE
    pred3d = pred2d.reshape(n, rows, _LANE)
    gt3d = gt2d.reshape(n, rows, _LANE)

    # --- tile sizing with correct VMEM accounting ----------------------------
    # Per sublane-row: 2 inputs x 2 pipeline buffers (native dtype)
    #                + 2 f32 elementwise accumulators.
    bytes_per_row = 2 * _LANE * (item_p + item_g) + 2 * _LANE * 4
    cap = _vmem_capacity_bytes()
    budget = cap // 3  # working-set target well under physical VMEM
    max_tile_budget = max(_SUB, (budget // bytes_per_row) // _SUB * _SUB)

    # >= ~1 MiB per input per step so the ~0.35 us per-step overhead is small,
    # but keep >= ~4 grid steps (DMA/compute overlap) on large inputs.
    min_tile = _round_up(max(_SUB, (1 << 20) // (_LANE * min(item_p, item_g))), _SUB)
    four_step = _round_up(pl.cdiv(rows, 4), _SUB)
    tile_r = min(max_tile_budget, max(four_step, min_tile))
    tile_r = max(_SUB, (tile_r // _SUB) * _SUB)
    if tile_r >= rows:
        tile_r = rows  # single full-extent block (always a legal block shape)
    needs_mask = (rows % tile_r) != 0

    r_blocks = pl.cdiv(rows, tile_r)
    grid = (n, r_blocks)

    working_bytes = tile_r * bytes_per_row
    vmem_limit = int(min(cap - (8 << 20), max(32 << 20, 2 * working_bytes)))

    kernel = functools.partial(
        _dice_partial_kernel,
        rows_total=rows,
        tile_r=tile_r,
        needs_mask=needs_mask,
    )

    parts = pl.pallas_call(
        kernel,
        out_shape=jax.ShapeDtypeStruct((n, 2, _LANE), jnp.float32),
        grid=grid,
        in_specs=[
            pl.BlockSpec((1, tile_r, _LANE), lambda i, r: (i, r, 0)),
            pl.BlockSpec((1, tile_r, _LANE), lambda i, r: (i, r, 0)),
        ],
        # Per-sample lane-wise (tp, denom) partials; resident across the
        # reduction axis, written once per sample at the last step.
        out_specs=pl.BlockSpec((1, 2, _LANE), lambda i, r: (i, 0, 0)),
        scratch_shapes=[
            pltpu.VMEM((tile_r, _LANE), jnp.float32),  # tp partials
            pltpu.VMEM((tile_r, _LANE), jnp.float32),  # pred+gt partials
        ],
        compiler_params=pltpu.CompilerParams(
            dimension_semantics=("parallel", "arbitrary"),
            vmem_limit_bytes=vmem_limit,
        ),
        cost_estimate=pl.CostEstimate(
            flops=4 * n * rows * _LANE,
            transcendentals=0,
            bytes_accessed=n * rows * _LANE * (item_p + item_g) + n * 2 * _LANE * 4,
        ),
    )(pred3d, gt3d)

    # Tiny finishing math (N x 128 elements) in the wrapper.
    tp = jnp.sum(parts[:, 0, :], axis=-1)
    denom = jnp.sum(parts[:, 1, :], axis=-1)
    dice = (2.0 * tp + EPS) / (denom + EPS)
    return 1.0 - jnp.mean(dice)


def binary_dice_loss_ref(y_pr, y_gt):
    # Pure-JAX reference mirroring the PyTorch code (activation=None).
    n = y_pr.shape[0]
    p = y_pr.reshape(n, -1).astype(jnp.float32)
    g = y_gt.reshape(n, -1).astype(jnp.float32)
    tp = jnp.sum(g * p, axis=1)
    fp = jnp.sum(p, axis=1) - tp
    fn = jnp.sum(g, axis=1) - tp
    dice = (2 * tp + EPS) / (2 * tp + fp + fn + EPS)
    return 1.0 - jnp.sum(dice) / n


if __name__ == "__main__":
    key = jax.random.PRNGKey(0)
    k1, k2 = jax.random.split(key)
    # Small NCHW shapes consistent with a segmentation head: (N=2, C=4, H=16, W=16)
    y_pr = jax.random.uniform(k1, (2, 4, 16, 16), dtype=jnp.float32)
    y_gt = (jax.random.uniform(k2, (2, 4, 16, 16), dtype=jnp.float32) > 0.5).astype(
        jnp.float32
    )

    loss = binary_dice_loss(y_pr, y_gt)
    loss = jax.block_until_ready(loss)

    ref = binary_dice_loss_ref(y_pr, y_gt)
    assert jnp.allclose(loss, ref, atol=1e-5, rtol=1e-5), (loss, ref)
    print("KERNEL_OK")
</pallas_src>

<mosaic_0001>
module attributes {stable_mosaic.version = 11 : i64} {
  func.func @_dice_partial_kernel(%arg0: i32, %arg1: i32, %arg2: memref<1x8x128xf32, #tpu.memory_space<vmem>>, %arg3: memref<1x8x128xf32, #tpu.memory_space<vmem>>, %arg4: memref<1x2x128xf32, #tpu.memory_space<vmem>>, %arg5: memref<8x128xf32, #tpu.memory_space<vmem>>, %arg6: memref<8x128xf32, #tpu.memory_space<vmem>>) attributes {dimension_semantics = [#tpu.dimension_semantics<parallel>, #tpu.dimension_semantics<arbitrary>], iteration_bounds = array<i64: 2, 1>, scalar_prefetch = 0 : i64, scratch_operands = 2 : i64, tpu.core_type = #tpu.core_type<tc>, window_params = [{transform_indices = @transform_0, window_bounds = array<i64: 1, 8, 128>}, {transform_indices = @transform_1, window_bounds = array<i64: 1, 8, 128>}, {transform_indices = @transform_2, window_bounds = array<i64: 1, 2, 128>}]} {
    %c0_i32 = arith.constant 0 : i32
    %0 = arith.cmpi eq, %arg1, %c0_i32 : i32
    %1 = arith.extui %0 : i1 to i32
    %c0_i32_0 = arith.constant 0 : i32
    %2 = arith.cmpi ne, %1, %c0_i32_0 : i32
    scf.if %2 {
      %cst = arith.constant 0.000000e+00 : f32
      %18 = vector.broadcast %cst : f32 to vector<8x128xf32>
      %c0_16 = arith.constant 0 : index
      %c0_17 = arith.constant 0 : index
      %19 = vector.load %arg5[%c0_16, %c0_17] : memref<8x128xf32, #tpu.memory_space<vmem>>, vector<8x128xf32>
      tpu.vector_store %arg5[%c0_16, %c0_17], %18 {strides = array<i32>} : memref<8x128xf32, #tpu.memory_space<vmem>>, vector<8x128xf32>,
      %cst_18 = arith.constant 0.000000e+00 : f32
      %20 = vector.broadcast %cst_18 : f32 to vector<8x128xf32>
      %c0_19 = arith.constant 0 : index
      %c0_20 = arith.constant 0 : index
      %21 = vector.load %arg6[%c0_19, %c0_20] : memref<8x128xf32, #tpu.memory_space<vmem>>, vector<8x128xf32>
      tpu.vector_store %arg6[%c0_19, %c0_20], %20 {strides = array<i32>} : memref<8x128xf32, #tpu.memory_space<vmem>>, vector<8x128xf32>,
    } else {
    }
    %c0 = arith.constant 0 : index
    %c0_1 = arith.constant 0 : index
    %c0_2 = arith.constant 0 : index
    %3 = vector.load %arg2[%c0, %c0_1, %c0_2] : memref<1x8x128xf32, #tpu.memory_space<vmem>>, vector<1x8x128xf32>
    %4 = vector.shape_cast %3 : vector<1x8x128xf32> to vector<8x128xf32>
    %c0_3 = arith.constant 0 : index
    %c0_4 = arith.constant 0 : index
    %c0_5 = arith.constant 0 : index
    %5 = vector.load %arg3[%c0_3, %c0_4, %c0_5] : memref<1x8x128xf32, #tpu.memory_space<vmem>>, vector<1x8x128xf32>
    %6 = vector.shape_cast %5 : vector<1x8x128xf32> to vector<8x128xf32>
    %c0_6 = arith.constant 0 : index
    %c0_7 = arith.constant 0 : index
    %7 = vector.load %arg5[%c0_6, %c0_7] : memref<8x128xf32, #tpu.memory_space<vmem>>, vector<8x128xf32>
    %8 = arith.mulf %6, %4 : vector<8x128xf32>
    %9 = arith.addf %7, %8 : vector<8x128xf32>
    %c0_8 = arith.constant 0 : index
    %c0_9 = arith.constant 0 : index
    %10 = vector.load %arg5[%c0_8, %c0_9] : memref<8x128xf32, #tpu.memory_space<vmem>>, vector<8x128xf32>
    tpu.vector_store %arg5[%c0_8, %c0_9], %9 {strides = array<i32>} : memref<8x128xf32, #tpu.memory_space<vmem>>, vector<8x128xf32>,
    %c0_10 = arith.constant 0 : index
    %c0_11 = arith.constant 0 : index
    %11 = vector.load %arg6[%c0_10, %c0_11] : memref<8x128xf32, #tpu.memory_space<vmem>>, vector<8x128xf32>
    %12 = arith.addf %4, %6 : vector<8x128xf32>
    %13 = arith.addf %11, %12 : vector<8x128xf32>
    %c0_12 = arith.constant 0 : index
    %c0_13 = arith.constant 0 : index
    %14 = vector.load %arg6[%c0_12, %c0_13] : memref<8x128xf32, #tpu.memory_space<vmem>>, vector<8x128xf32>
    tpu.vector_store %arg6[%c0_12, %c0_13], %13 {strides = array<i32>} : memref<8x128xf32, #tpu.memory_space<vmem>>, vector<8x128xf32>,
    %c0_i32_14 = arith.constant 0 : i32
    %15 = arith.cmpi eq, %arg1, %c0_i32_14 : i32
    %16 = arith.extui %15 : i1 to i32
    %c0_i32_15 = arith.constant 0 : i32
    %17 = arith.cmpi ne, %16, %c0_i32_15 : i32
    scf.if %17 {
      %c0_16 = arith.constant 0 : index
      %c0_17 = arith.constant 0 : index
      %18 = vector.load %arg5[%c0_16, %c0_17] : memref<8x128xf32, #tpu.memory_space<vmem>>, vector<8x128xf32>
      %cst = arith.constant dense<0.000000e+00> : vector<128xf32>
      %19 = vector.multi_reduction <add>, %18, %cst [0] : vector<8x128xf32> to vector<128xf32>
      %20 = vector.shape_cast %19 : vector<128xf32> to vector<1x128xf32>
      %c0_18 = arith.constant 0 : index
      %c0_19 = arith.constant 0 : index
      %c0_20 = arith.constant 0 : index
      %21 = vector.load %arg4[%c0_18, %c0_19, %c0_20] : memref<1x2x128xf32, #tpu.memory_space<vmem>>, vector<1x1x128xf32>
      %22 = vector.shape_cast %21 : vector<1x1x128xf32> to vector<1x128xf32>
      %23 = vector.shape_cast %20 : vector<1x128xf32> to vector<1x1x128xf32>
      tpu.vector_store %arg4[%c0_18, %c0_19, %c0_20], %23 {strides = array<i32>} : memref<1x2x128xf32, #tpu.memory_space<vmem>>, vector<1x1x128xf32>,
      %c0_21 = arith.constant 0 : index
      %c0_22 = arith.constant 0 : index
      %24 = vector.load %arg6[%c0_21, %c0_22] : memref<8x128xf32, #tpu.memory_space<vmem>>, vector<8x128xf32>
      %cst_23 = arith.constant dense<0.000000e+00> : vector<128xf32>
      %25 = vector.multi_reduction <add>, %24, %cst_23 [0] : vector<8x128xf32> to vector<128xf32>
      %26 = vector.shape_cast %25 : vector<128xf32> to vector<1x128xf32>
      %c0_24 = arith.constant 0 : index
      %c1 = arith.constant 1 : index
      %c0_25 = arith.constant 0 : index
      %27 = vector.load %arg4[%c0_24, %c1, %c0_25] : memref<1x2x128xf32, #tpu.memory_space<vmem>>, vector<1x1x128xf32>
      %28 = vector.shape_cast %27 : vector<1x1x128xf32> to vector<1x128xf32>
      %29 = vector.shape_cast %26 : vector<1x128xf32> to vector<1x1x128xf32>
      tpu.vector_store %arg4[%c0_24, %c1, %c0_25], %29 {strides = array<i32>} : memref<1x2x128xf32, #tpu.memory_space<vmem>>, vector<1x1x128xf32>,
    } else {
    }
    return
  }
  func.func @transform_0(%arg0: i32, %arg1: i32) -> (i32, i32, i32) {
    %c0_i32 = arith.constant 0 : i32
    %c0_i32_0 = arith.constant 0 : i32
    return %arg0, %arg1, %c0_i32 : i32, i32, i32
  }
  func.func @transform_1(%arg0: i32, %arg1: i32) -> (i32, i32, i32) {
    %c0_i32 = arith.constant 0 : i32
    %c0_i32_0 = arith.constant 0 : i32
    return %arg0, %arg1, %c0_i32 : i32, i32, i32
  }
  func.func @transform_2(%arg0: i32, %arg1: i32) -> (i32, i32, i32) {
    %c0_i32 = arith.constant 0 : i32
    %c0_i32_0 = arith.constant 0 : i32
    %c0_i32_1 = arith.constant 0 : i32
    return %arg0, %c0_i32, %c0_i32_0 : i32, i32, i32
  }
}

</mosaic_0001>

<bundles_post_ra>
// kernel: tpu_custom_call.1
= control target key start
LH: loop header
LB: loop body
LE: loop exit
PB: predicated region body
PF: predicated region fallthrough
CT: control target
= control target key end

     0   :  { %7 = vsyncpa [#allocation5], 0  ;;  %s836_s0 = inlined_call_operand.hbm [shape: f32[2,8,128], index: 0, kind: input, shape index: {}]   ;;  %s837_s1 = inlined_call_operand.hbm [shape: f32[2,8,128], index: 1, kind: input, shape index: {}]   ;;  %s838_s2 = inlined_call_operand.hbm [shape: f32[2,2,128], index: 2, kind: output, shape index: {}]  }
   0x1   :  { %9 = vsyncpa [#allocation5 + $0x1], 0 }
   0x2   :  { %10 = vsyncpa [#allocation8], 0 }
   0x3   :  { %12 = vsyncpa [#allocation8 + $0x1], 0 }
   0x4   :  { %13 = vsyncpa [#allocation6], 0 }
   0x5   :  { %15 = vsyncpa [#allocation6 + $0x1], 0  ;;  %s615_s9 = smov 0   ;;  %s617_s10 = smov 0  }
   0x6   :  { %s619_s11 = smov 0   ;;  %s621_s12 = smov 0  }
   0x7   :  { %s623_s13 = smov 0   ;;  %s625_s14 = smov 0  }
   0x8 LB: > { %s366_s15 = sadd.s32 4294967295, %s595_s14   ;;  %s367_s16 = sadd.s32 4294967294, %s595_s14   ;;  %s595_s14 = sphi %s625_s14, %s21_s14   ;;  %s591_s13 = sphi %s623_s13, %s858_s13   ;;  %s587_s12 = sphi %s621_s12, %s857_s12   ;;  %s583_s11 = sphi %s619_s11, %s856_s11   ;;  %s579_s10 = sphi %s617_s10, %s855_s10   ;;  %s575_s9 = sphi %s615_s9, %s854_s9  }
   0x9   : > { %s33_s17 = sadd.s32 1, %s591_s13  ;;  %s42_s18 = sadd.s32 1, %s583_s11 }
   0xa   : > { %p35_p0 = scmp.ge.s32.totalorder %s33_s17, 2  ;;  %p49_p1 = scmp.ne.s32.totalorder %s583_s11, %s579_s10 }
   0xb   : > { %p50_p2 = scmp.eq.s32.totalorder %s595_s14, 0  ;;  %p55_p3 = scmp.ne.s32.totalorder %s579_s10, %s575_s9 }
   0xc   : > { %s860_s17 = smov (%p35_p0, %s33_s17), 0  ;;  %p56_p5 = scmp.eq.s32.totalorder %s366_s15, 0 }
   0xd   : > { %p656_p4 = por %p50_p2, %p49_p1  ;;  %s37_s20 = ssub.s32 %s591_s13, %s860_s17 }
   0xe   : > { %p107_p6 = scmp.eq.s32.totalorder %s366_s15, 1  ;;  %p40_p7 = scmp.eq.s32.totalorder %s37_s20, 0 }
   0xf   : > { %p662_p8 = por %p56_p5, %p55_p3  ;;  %p113_p10 = scmp.eq.s32.totalorder %s367_s16, 1 }
  0x10   : > { %p666_p9 = por %p107_p6, %p49_p1  ;;  %p399_p13 = scmp.lt.s32.totalorder %s595_s14, 2 }
  0x11   : > { %s842_s21 = scalar_select %p662_p8, 1, 0 }
  0x12   : > { %s843_s22 = scalar_select %p666_p9, 1, 0 }
  0x13   : > { %s671_s23 = scalar_select %p40_p7, %s583_s11, %s42_s18  }
  0x14   : > { %p673_p11 = por %p113_p10, %p55_p3  ;;  %s680_s25 = sand.u32 1, %s583_s11  }
  0x15   : > { %s370_s26 = sshll.u32 %s680_s25, 3  ;;  %s371_s27 = sshll.u32 %s591_s13, 7 }
  0x16   : > { %s844_s24 = scalar_select %p673_p11, 1, 0 }
  0x17   : > { %s689_s30 = scalar_lea.hbm %s836_s0, %s371_s27  ;;  %s137_s3 = scalar_lea.vmem [#allocation4], %s370_s26 }
  0x18   : > { %s145_s4 = sshll.u32 %s137_s3, 4  ;;  %p697_p0 = pnand %p399_p13, %p656_p4  ;;  %s693_s4 = int_to_ptr.vmem [resolvable:$true] %s145_s4 }
  0x19   : > { %s134_s6 = scalar_lea.sflag [#allocation5], %s680_s25  ;;  %s449_s7 = scalar_lea.hbm %s689_s30, 128 }
  0x1a   : > { %p450_p3 = scmp.ne.s32.totalorder %s689_s30, %s449_s7  ;;  %p451_p5 = pneg %p697_p0 }
  0x1b   : > { %s454_s16 = scalar_lea.hbm %s836_s0, 256  ;;  %p455_p4 = scmp.lt.u32.totalorder %s689_s30, %s836_s0 }
  0x1c   : > { %p452_p6 = pnand %p451_p5, %p450_p3  ;;  %p456_p10 = scmp.lt.u32.totalorder %s454_s16, %s449_s7 }
  0x1d   : > { %p458_p12 = scmp.lt.u32.totalorder %s449_s7, %s689_s30 }
  0x1e   : > { %p453_p7 = pneg %p452_p6  ;;  %p457_p13 = por %p456_p10, %p455_p4 }
  0x20   : > { %p459_p1 = por %p458_p12, %p457_p13 }
  0x22   : > { %p460_p2 = pnand %p459_p1, %p453_p7 }
  0x24   : > { %463 = shalt.err (!%p460_p2)
}
  0x25   : > { %s464_s20 = scalar_lea.vmem %s693_s4, 128  ;;  %s597_s28 = smov [#allocation4]  }
  0x26   : > { %p465_p3 = scmp.ne.s32.totalorder %s693_s4, %s464_s20  ;;  %s469_s29 = sshll.u32 %s597_s28, 4  ;;  %s470_s29 = int_to_ptr.vmem [resolvable:$false] %s469_s29 }
  0x27   : > { %s471_s3 = scalar_lea.vmem %s470_s29, 256  ;;  %p472_p9 = scmp.lt.s32.totalorder %s693_s4, %s470_s29 }
  0x28   : > { %p467_p6 = pnand %p465_p3, %p451_p5  ;;  %p473_p4 = scmp.lt.s32.totalorder %s471_s3, %s464_s20 }
  0x2a   : > { %p468_p11 = pneg %p467_p6  ;;  %p474_p10 = por %p473_p4, %p472_p9 }
  0x2c   : > { %p475_p12 = pnand %p474_p10, %p468_p11 }
  0x2e   : > { %478 = shalt.err (!%p475_p12)
}
  0x2f   : > { %391 = dma.hbm_to_vmem [thread:$0]  (!%p697_p0), %s689_s30, 128, %s693_s4, %s134_s6  }
  0x30   : > { %p846_p1 = scmp.lt.s32.totalorder %s595_s14, 3  ;;  %p847_p2 = scmp.ge.s32.totalorder %s595_s14, 1 }
  0x31   : > { %s742_s16 = scalar_lea.hbm %s837_s1, %s371_s27  ;;  %s156_s18 = scalar_lea.vmem [#allocation7], %s370_s26 }
  0x32   : > { %p733_p7 = pnand %p847_p2, %p846_p1  ;;  %s164_s19 = sshll.u32 %s156_s18, 4  ;;  %s165_s19 = int_to_ptr.vmem [resolvable:$true] %s164_s19 }
  0x33   : > { %s153_s30 = scalar_lea.sflag [#allocation8], %s680_s25  ;;  %s479_s4 = scalar_lea.hbm %s742_s16, 128 }
  0x34   : > { %s848_s7 = scalar_select %p733_p7, 1, 0 }
  0x35   : > { %p480_p9 = scmp.ne.s32.totalorder %s742_s16, %s479_s4  ;;  %s484_s27 = scalar_lea.hbm %s837_s1, 256 }
  0x36   : > { %p485_p3 = scmp.lt.u32.totalorder %s742_s16, %s837_s1  ;;  %p486_p6 = scmp.lt.u32.totalorder %s484_s27, %s479_s4 }
  0x37   : > { %p482_p11 = pnand %p480_p9, %p451_p5  ;;  %p488_p10 = scmp.lt.u32.totalorder %s479_s4, %s742_s16 }
  0x38   : > { %p487_p4 = por %p486_p6, %p485_p3 }
  0x39   : > { %p483_p13 = pneg %p482_p11 }
  0x3a   : > { %p489_p12 = por %p488_p10, %p487_p4 }
  0x3c   : > { %p490_p1 = pnand %p489_p12, %p483_p13 }
  0x3e   : > { %493 = shalt.err (!%p490_p1)
}
  0x3f   : > { %s494_s25 = scalar_lea.vmem %s165_s19, 128  ;;  %s598_s26 = smov [#allocation7]  }
  0x40   : > { %p495_p2 = scmp.ne.s32.totalorder %s165_s19, %s494_s25  ;;  %s499_s3 = sshll.u32 %s598_s26, 4  ;;  %s500_s3 = int_to_ptr.vmem [resolvable:$false] %s499_s3 }
  0x41   : > { %s501_s8 = scalar_lea.vmem %s500_s3, 256  ;;  %p502_p8 = scmp.lt.s32.totalorder %s165_s19, %s500_s3 }
  0x42   : > { %p497_p9 = pnand %p495_p2, %p451_p5  ;;  %p503_p7 = scmp.lt.s32.totalorder %s501_s8, %s494_s25 }
  0x44   : > { %p498_p11 = pneg %p497_p9  ;;  %p504_p3 = por %p503_p7, %p502_p8 }
  0x46   : > { %p505_p6 = pnand %p504_p3, %p498_p11 }
  0x48   : > { %508 = shalt.err (!%p505_p6)
}
  0x49   : > { %394 = dma.hbm_to_vmem [thread:$0]  (!%p697_p0), %s742_s16, 128, %s165_s19, %s153_s30  }
  0x4a   : > { %p849_p13 = scmp.ne.s32.totalorder %s848_s7, 0 }
  0x4b   : > { %s769_s15 = sand.u32 (!%p849_p13), 1, %s579_s10   ;;  %p850_p5 = scmp.ne.s32.totalorder (!%p849_p13), %s842_s21, 0 }
  0x4c   : > { %173 = sbr.rel (%p849_p13) target bundleno = 115 (0x73), region = 28  ;;  %s375_s18 = sshll.u32 (!%p849_p13), %s769_s15, 3 }
  0x4d   : > { %s176_s4 = scalar_lea.sflag (!%p849_p13), [#allocation5], %s769_s15  ;;  %s179_s6 = scalar_lea.vmem (!%p849_p13), [#allocation4], %s375_s18 }
  0x53   : > { %562 = dma.done.wait (%p850_p5), %s176_s4, 128  }
  0x54   : > { %564 = vsyncadd (%p850_p5), %s176_s4, 4294967168  ;;  %s185_s5 = scalar_lea.sflag [#allocation8], %s769_s15  ;;  %s188_s16 = scalar_lea.vmem [#allocation7], %s375_s18 }
  0x55   : > { %566 = dma.done.wait (%p850_p5), %s185_s5, 128  }
  0x56   : > { %568 = vsyncadd (%p850_p5), %s185_s5, 4294967168  ;;  %v220_v0 = vld [vmem:[%s179_s6] sm:$0xff]  ;;  %v221_v1 = vld [vmem:[%s188_s16] sm:$0xff]  ;;  %s377_s7 = sshll.u32 %s769_s15, 1  ;;  %s379_s30 = sshll.u32 %s587_s12, 5 }
  0x57   : > { %v223_v2 = vmul.f32 %v221_v1, %v220_v0  ;;  %v227_v3 = vadd.f32 %v221_v1, %v220_v0  ;;  %s213_s19 = scalar_lea.vmem [#allocation9], %s377_s7  ;;  %s789_s28 = scalar_lea.hbm %s838_s2, %s379_s30 }
  0x58   : > { %s263_s21 = sshll.u32 %s213_s19, 4  ;;  %s250_s29 = scalar_lea.sflag [#allocation6], %s769_s15  ;;  %s784_s21 = int_to_ptr.vmem [resolvable:$true] %s263_s21 }
  0x59   : > { %v234_v4 = vrot.slane %v223_v2, 4  ;;  %v242_v5 = vrot.slane %v227_v3, 4  ;;  %s509_s25 = scalar_lea.vmem %s784_s21, 32  ;;  %p851_p0 = scmp.ne.s32.totalorder %s843_s22, 0 }
  0x5a   : > { %p510_p8 = scmp.ne.s32.totalorder %s784_s21, %s509_s25  ;;  %s599_s12 = smov [#allocation9]  }
  0x5b   : > { %v235_v6 = vadd.f32 %v234_v4, %v223_v2  ;;  %v243_v7 = vadd.f32 %v242_v5, %v227_v3  ;;  %s513_s26 = sshll.u32 %s599_s12, 4  ;;  %s514_s26 = int_to_ptr.vmem [resolvable:$false] %s513_s26 }
  0x5c   : > { %p511_p7 = pnand %p510_p8, %p851_p0  ;;  %s515_s3 = scalar_lea.vmem %s514_s26, 64 }
  0x5d   : > { %v236_v8 = vrot.slane %v235_v6, 2  ;;  %v244_v9 = vrot.slane %v243_v7, 2  ;;  %p516_p10 = scmp.lt.s32.totalorder %s784_s21, %s514_s26  ;;  %p517_p12 = scmp.lt.s32.totalorder %s515_s3, %s509_s25 }
  0x5e   : > { %p512_p4 = pneg %p511_p7 }
  0x5f   : > { %v237_v10 = vadd.f32 %v236_v8, %v235_v6  ;;  %v245_v11 = vadd.f32 %v244_v9, %v243_v7  ;;  %p518_p1 = por %p517_p12, %p516_p10 }
  0x61   : > { %v238_v12 = vrot.slane %v237_v10, 1  ;;  %v246_v13 = vrot.slane %v245_v11, 1  ;;  %p519_p2 = pnand %p518_p1, %p512_p4 }
  0x63   : > { %v239_v14 = vadd.f32 %v238_v12, %v237_v10  ;;  %v247_v15 = vadd.f32 %v246_v13, %v245_v11 }
  0x65   : > { %240 = vst [vmem:[%s213_s19] sm:$0x1] %v239_v14  ;;  %248 = vst [vmem:[%s213_s19 + $0x1] sm:$0x1] %v247_v15 }
  0x66   : > { %522 = shalt.err (!%p519_p2)
}
  0x67   : > { %s523_s8 = scalar_lea.hbm %s789_s28, 32  ;;  %s527_s4 = scalar_lea.hbm %s838_s2, 64 }
  0x68   : > { %p524_p9 = scmp.ne.s32.totalorder %s789_s28, %s523_s8  ;;  %p528_p6 = scmp.lt.u32.totalorder %s789_s28, %s838_s2 }
  0x69   : > { %p529_p13 = scmp.lt.u32.totalorder %s527_s4, %s523_s8  ;;  %p531_p8 = scmp.lt.u32.totalorder %s523_s8, %s789_s28 }
  0x6a   : > { %p525_p11 = pnand %p524_p9, %p851_p0 }
  0x6b   : > { %p530_p5 = por %p529_p13, %p528_p6 }
  0x6c   : > { %p526_p3 = pneg %p525_p11 }
  0x6d   : > { %p532_p7 = por %p531_p8, %p530_p5 }
  0x6f   : > { %p533_p4 = pnand %p532_p7, %p526_p3 }
  0x71   : > { %536 = shalt.err (!%p533_p4)
}
  0x72   : > { %386 = dma.vmem_to_hbm [thread:$0]  (%p851_p0), %s784_s21, 32, %s789_s28, %s250_s29  }
  0x73 PF: > { %s275_s16 = sand.u32 1, %s575_s9   ;;  %p852_p10 = scmp.ne.s32.totalorder %s844_s24, 0 }
  0x74   : > { %p853_p12 = scmp.ge.s32.totalorder %s595_s14, 2  ;;  %s276_s7 = scalar_lea.sflag [#allocation6], %s275_s16 }
  0x76   : > { %p396_p1 = pnand %p853_p12, %p852_p10 }
  0x78   : > { %570 = dma.done.wait (!%p396_p1), %s276_s7, 32  }
  0x79   : > { %572 = vsyncadd (!%p396_p1), %s276_s7, 4294967264  ;;  %s21_s14 = sadd.s32 1, %s595_s14   ;;  %s854_s9 = smov %s579_s10 }
  0x7a   : > { %p18_p2 = scmp.ge.s32.totalorder %s21_s14, 4   ;;  %s855_s10 = smov %s583_s11 }
  0x7b   : > { %s856_s11 = smov %s671_s23  ;;  %s857_s12 = smov %s591_s13 }
  0x7c   : > { %s858_s13 = smov %s860_s17  ;;  %20 = sbr.rel (!%p18_p2) target bundleno = 8 (0x8), region = 94 }
  0x83   :  { %281 = vsyncpa [#allocation5], 1 }
  0x84   :  { %283 = vsyncpa [#allocation5 + $0x1], 1 }
  0x85   :  { %284 = vsyncpa [#allocation8], 1 }
  0x86   :  { %286 = vsyncpa [#allocation8 + $0x1], 1 }
  0x87   :  { %287 = vsyncpa [#allocation6], 1 }
  0x88   :  { %289 = vsyncpa [#allocation6 + $0x1], 1 }

</bundles_post_ra>
